<compile_context>
chip_gen: v7x
topology: tpu7x:2x2x1
jax: 0.10.0
libtpu: 0.0.40
codegen_flags: <defaults>
</compile_context>

<pallas_src>
import jax
import jax.numpy as jnp
from jax.experimental import pallas as pl
from jax.experimental.pallas import tpu as pltpu


def _round_up(x, m):
    return ((x + m - 1) // m) * m


def _cdiv(a, b):
    return -(-a // b)


# ----------------------------------------------------------------------------
# Kernel
# ----------------------------------------------------------------------------
def actor_kernel(state_ref, w1_ref, b1_ref, w2_ref, b2_ref, out_ref):
    # fc1: (TB, S) @ (S, H) on the MXU.  Cast the f32 state tile to the weight
    # dtype (bf16) in-kernel; the VPU cast hides under the DMA/MXU and avoids
    # materializing a bf16 copy of the state in HBM.  f32 accumulation.
    x = jnp.dot(state_ref[...].astype(w1_ref.dtype), w1_ref[...],
                preferred_element_type=jnp.float32)
    x = jnp.maximum(x + b1_ref[...], 0.0)                   # bias + ReLU (VPU, f32)
    # fc2: (TB, H) @ (H, A) kept in f32 — K=128 and N=A is tiny, so the MXU
    # rate is irrelevant and f32 avoids quantizing the action mean.
    y = jnp.dot(x, w2_ref[...], preferred_element_type=jnp.float32)
    out_ref[...] = jnp.tanh(y + b2_ref[...]).astype(out_ref.dtype)   # tanh on EUP


# ----------------------------------------------------------------------------
# One-time parameter preparation (cast / reshape outside the per-call path)
# ----------------------------------------------------------------------------
def prepare_params(w1, b1, w2, b2, *, compute_dtype=jnp.bfloat16):
    """w1: (S, H), w2: (H, A) stored as (in, out) == PyTorch Linear weight.T.

    Biases may be (H,)/(A,) or (1, H)/(1, A).  Call once, reuse every forward.
    """
    w1 = jnp.asarray(w1).astype(compute_dtype)          # fc1 operand -> bf16 (MXU)
    w2 = jnp.asarray(w2, dtype=jnp.float32)             # fc2 stays f32
    b1 = jnp.asarray(b1, dtype=jnp.float32).reshape(1, -1)
    b2 = jnp.asarray(b2, dtype=jnp.float32).reshape(1, -1)
    assert b1.shape[1] == w1.shape[1] and b2.shape[1] == w2.shape[1]
    return w1, b1, w2, b2


# ----------------------------------------------------------------------------
# Forward wrapper
# ----------------------------------------------------------------------------
def actor_forward(state, params, *, block_b=1024):
    """state: (B, S) float32; params from prepare_params().  Returns (B, A) f32."""
    w1, b1, w2, b2 = params
    B, S = state.shape
    H = w1.shape[1]
    A = w2.shape[1]

    # --- batch tile selection ------------------------------------------------
    # Minimize padding of the last tile, keep TB a multiple of 16, and force
    # >= 2 grid steps whenever the batch is big enough so that
    # dimension_semantics=("parallel",) actually shards across v7x's two TCs.
    n_tiles = max(1, _cdiv(B, block_b))
    if B >= 32:                       # batch big enough to split into 2x 16-row tiles
        n_tiles = max(n_tiles, 2)
    TB = _round_up(_cdiv(B, n_tiles), 16)
    B_pad = _round_up(B, TB)
    grid_b = B_pad // TB

    state_p = state
    if B_pad != B:
        state_p = jnp.pad(state, ((0, B_pad - B), (0, 0)))

    cost = pl.CostEstimate(
        flops=2 * B_pad * (S * H + H * A),
        transcendentals=B_pad * A,                            # tanh (EUP)
        bytes_accessed=(B_pad * S * state_p.dtype.itemsize    # state in
                        + S * H * w1.dtype.itemsize           # w1 (bf16)
                        + H * A * 4                           # w2 (f32)
                        + (H + A) * 4                         # biases
                        + B_pad * A * 4),                     # output (unpadded f32)
    )

    out_p = pl.pallas_call(
        actor_kernel,
        out_shape=jax.ShapeDtypeStruct((B_pad, A), jnp.float32),
        grid=(grid_b,),
        in_specs=[
            pl.BlockSpec((TB, S), lambda i: (i, 0)),          # state tile streams
            pl.BlockSpec((S, H), lambda i: (0, 0)),           # w1 resident (bf16)
            pl.BlockSpec((1, H), lambda i: (0, 0)),           # b1 resident (f32)
            pl.BlockSpec((H, A), lambda i: (0, 0)),           # w2 resident (f32)
            pl.BlockSpec((1, A), lambda i: (0, 0)),           # b2 resident (f32)
        ],
        out_specs=pl.BlockSpec((TB, A), lambda i: (i, 0)),
        compiler_params=pltpu.CompilerParams(
            dimension_semantics=("parallel",),                # batch axis sharded
        ),
        cost_estimate=cost,
    )(state_p, w1, b1, w2, b2)

    return out_p[:B]


# ----------------------------------------------------------------------------
# Deterministic init mirroring PyTorch Linear default U[-1/sqrt(fan_in), +]
# ----------------------------------------------------------------------------
def init_params(key, state_dim, action_dim, hidden_dim=128):
    k1, k2, k3, k4 = jax.random.split(key, 4)
    bound1 = 1.0 / jnp.sqrt(state_dim)
    bound2 = 1.0 / jnp.sqrt(hidden_dim)
    # Stored as (in, out) == PyTorch weight.T
    w1 = jax.random.uniform(k1, (state_dim, hidden_dim), jnp.float32, -bound1, bound1)
    b1 = jax.random.uniform(k2, (hidden_dim,), jnp.float32, -bound1, bound1)
    w2 = jax.random.uniform(k3, (hidden_dim, action_dim), jnp.float32, -bound2, bound2)
    b2 = jax.random.uniform(k4, (action_dim,), jnp.float32, -bound2, bound2)
    return w1, b1, w2, b2


if __name__ == "__main__":
    key = jax.random.PRNGKey(0)
    kp, ks = jax.random.split(key)

    batch = 8
    state_dim = 32
    hidden_dim = 128
    action_dim = 8

    w1, b1, w2, b2 = init_params(kp, state_dim, action_dim, hidden_dim)
    params = prepare_params(w1, b1, w2, b2)           # one-time cast / reshape
    state = jax.random.normal(ks, (batch, state_dim), jnp.float32)

    out = actor_forward(state, params)
    out = jax.block_until_ready(out)
    assert out.shape == (batch, action_dim)

    # Reference using the same recipe as the kernel: bf16-operand fc1 with f32
    # accumulation, f32 fc2.
    b1_r = b1.reshape(1, -1)
    b2_r = b2.reshape(1, -1)
    x_ref = jnp.maximum(
        jnp.dot(state.astype(jnp.bfloat16), w1.astype(jnp.bfloat16),
                preferred_element_type=jnp.float32) + b1_r, 0.0)
    ref = jnp.tanh(jnp.dot(x_ref, w2.astype(jnp.float32),
                           preferred_element_type=jnp.float32) + b2_r)
    assert jnp.allclose(out, ref, atol=2e-3, rtol=2e-3), float(
        jnp.max(jnp.abs(out - ref)))

    # Coarse check against the full-f32 PyTorch-equivalent reference.
    ref32 = jnp.tanh(jnp.maximum(state @ w1 + b1_r, 0.0) @ w2 + b2_r)
    assert jnp.allclose(out, ref32, atol=5e-2), float(
        jnp.max(jnp.abs(out - ref32)))

    print("KERNEL_OK")
</pallas_src>

<mosaic_0001>
module attributes {stable_mosaic.version = 11 : i64} {
  func.func @actor_kernel(%arg0: i32, %arg1: memref<16x32xf32, #tpu.memory_space<vmem>>, %arg2: memref<32x128xbf16, #tpu.memory_space<vmem>>, %arg3: memref<1x128xf32, #tpu.memory_space<vmem>>, %arg4: memref<128x8xf32, #tpu.memory_space<vmem>>, %arg5: memref<1x8xf32, #tpu.memory_space<vmem>>, %arg6: memref<16x8xf32, #tpu.memory_space<vmem>>) attributes {dimension_semantics = [#tpu.dimension_semantics<parallel>], iteration_bounds = array<i64: 1>, scalar_prefetch = 0 : i64, scratch_operands = 0 : i64, tpu.core_type = #tpu.core_type<tc>, window_params = [{transform_indices = @transform_0, window_bounds = array<i64: 16, 32>}, {pipeline_mode = #tpu.pipeline_mode<synchronous>, transform_indices = @transform_1, window_bounds = array<i64: 32, 128>}, {pipeline_mode = #tpu.pipeline_mode<synchronous>, transform_indices = @transform_2, window_bounds = array<i64: 1, 128>}, {pipeline_mode = #tpu.pipeline_mode<synchronous>, transform_indices = @transform_3, window_bounds = array<i64: 128, 8>}, {pipeline_mode = #tpu.pipeline_mode<synchronous>, transform_indices = @transform_4, window_bounds = array<i64: 1, 8>}, {transform_indices = @transform_5, window_bounds = array<i64: 16, 8>}]} {
    %c0 = arith.constant 0 : index
    %c0_0 = arith.constant 0 : index
    %0 = vector.load %arg1[%c0, %c0_0] : memref<16x32xf32, #tpu.memory_space<vmem>>, vector<16x32xf32>
    %1 = arith.truncf %0 : vector<16x32xf32> to vector<16x32xbf16>
    %c0_1 = arith.constant 0 : index
    %c0_2 = arith.constant 0 : index
    %2 = vector.load %arg2[%c0_1, %c0_2] : memref<32x128xbf16, #tpu.memory_space<vmem>>, vector<32x128xbf16>
    %cst = arith.constant dense<0.000000e+00> : vector<16x128xf32>
    %3 = tpu.matmul %1, %2, %cst {dimension_numbers = #tpu.dot_dimension_numbers<[1], [0], [0], [1], [0, 0, 1, 1], [], []>} : vector<16x32xbf16>, vector<32x128xbf16>, vector<16x128xf32> -> vector<16x128xf32>
    %c0_3 = arith.constant 0 : index
    %c0_4 = arith.constant 0 : index
    %4 = vector.load %arg3[%c0_3, %c0_4] : memref<1x128xf32, #tpu.memory_space<vmem>>, vector<1x128xf32>
    %5 = vector.broadcast %4 : vector<1x128xf32> to vector<16x128xf32>
    %6 = arith.addf %3, %5 : vector<16x128xf32>
    %cst_5 = arith.constant 0.000000e+00 : f32
    %7 = vector.broadcast %cst_5 : f32 to vector<16x128xf32>
    %8 = arith.maximumf %6, %7 : vector<16x128xf32>
    %c0_6 = arith.constant 0 : index
    %c0_7 = arith.constant 0 : index
    %9 = vector.load %arg4[%c0_6, %c0_7] : memref<128x8xf32, #tpu.memory_space<vmem>>, vector<128x8xf32>
    %cst_8 = arith.constant dense<0.000000e+00> : vector<16x8xf32>
    %10 = tpu.matmul %8, %9, %cst_8 {dimension_numbers = #tpu.dot_dimension_numbers<[1], [0], [0], [1], [0, 0, 1, 1], [], []>} : vector<16x128xf32>, vector<128x8xf32>, vector<16x8xf32> -> vector<16x8xf32>
    %c0_9 = arith.constant 0 : index
    %c0_10 = arith.constant 0 : index
    %11 = vector.load %arg5[%c0_9, %c0_10] : memref<1x8xf32, #tpu.memory_space<vmem>>, vector<1x8xf32>
    %12 = vector.broadcast %11 : vector<1x8xf32> to vector<16x8xf32>
    %13 = arith.addf %10, %12 : vector<16x8xf32>
    %14 = math.tanh %13 : vector<16x8xf32>
    %c0_11 = arith.constant 0 : index
    %c0_12 = arith.constant 0 : index
    %15 = vector.load %arg6[%c0_11, %c0_12] : memref<16x8xf32, #tpu.memory_space<vmem>>, vector<16x8xf32>
    tpu.vector_store %arg6[%c0_11, %c0_12], %14 {strides = array<i32>} : memref<16x8xf32, #tpu.memory_space<vmem>>, vector<16x8xf32>,
    return
  }
  func.func @transform_0(%arg0: i32) -> (i32, i32) {
    %c0_i32 = arith.constant 0 : i32
    %c0_i32_0 = arith.constant 0 : i32
    return %arg0, %c0_i32 : i32, i32
  }
  func.func @transform_1(%arg0: i32) -> (i32, i32) {
    %c0_i32 = arith.constant 0 : i32
    %c0_i32_0 = arith.constant 0 : i32
    %c0_i32_1 = arith.constant 0 : i32
    return %c0_i32, %c0_i32_0 : i32, i32
  }
  func.func @transform_2(%arg0: i32) -> (i32, i32) {
    %c0_i32 = arith.constant 0 : i32
    %c0_i32_0 = arith.constant 0 : i32
    %c0_i32_1 = arith.constant 0 : i32
    return %c0_i32, %c0_i32_0 : i32, i32
  }
  func.func @transform_3(%arg0: i32) -> (i32, i32) {
    %c0_i32 = arith.constant 0 : i32
    %c0_i32_0 = arith.constant 0 : i32
    %c0_i32_1 = arith.constant 0 : i32
    return %c0_i32, %c0_i32_0 : i32, i32
  }
  func.func @transform_4(%arg0: i32) -> (i32, i32) {
    %c0_i32 = arith.constant 0 : i32
    %c0_i32_0 = arith.constant 0 : i32
    %c0_i32_1 = arith.constant 0 : i32
    return %c0_i32, %c0_i32_0 : i32, i32
  }
  func.func @transform_5(%arg0: i32) -> (i32, i32) {
    %c0_i32 = arith.constant 0 : i32
    %c0_i32_0 = arith.constant 0 : i32
    return %arg0, %c0_i32 : i32, i32
  }
}

</mosaic_0001>

<bundles_post_ra>
// kernel: tpu_custom_call.1
= control target key start
LH: loop header
LB: loop body
LE: loop exit
PB: predicated region body
PF: predicated region fallthrough
CT: control target
= control target key end

     0   :  { %v310_v0 = vmov 0.0   ;;  %vm311_vm0 = vmmov 0   ;;  %vm47_vm1 = vcmask 261120   ;;  %vm194_vm2 = vcmask 64512   ;;  %s414_s1 = inlined_call_operand.vmem [shape: bf16[32,128], index: 1, kind: input, shape index: {}]   ;;  %s415_s0 = inlined_call_operand.vmem [shape: f32[16,32], index: 0, kind: input, shape index: {}]   ;;  %s416_s3 = inlined_call_operand.vmem [shape: f32[128,8], index: 3, kind: input, shape index: {}]   ;;  %s417_s2 = inlined_call_operand.vmem [shape: f32[1,128], index: 2, kind: input, shape index: {}]   ;;  %s418_s4 = inlined_call_operand.vmem [shape: f32[1,8], index: 4, kind: input, shape index: {}]   ;;  %s419_s5 = inlined_call_operand.vmem [shape: f32[16,8], index: 5, kind: output, shape index: {}]  }
   0x1   :  { %227 = vmatprep.subr.bf16.mxu0 %v310_v0  ;;  %v304_v1 = vld [vmem:[%s414_s1] sm:$0xff]   ;;  %231 = vmatprep.mubr.msk.bf16.mxu0 %vm311_vm0, %v310_v0  ;;  %v305_v2 = vld [vmem:[%s414_s1 + $0x8] sm:$0xff]   ;;  %v96_v7 = vld [vmem:[%s416_s3 + $0x10] sm:$0xff] }
   0x2   :  { %228 = vmatpush3.bf16.msra.mxu0 %v304_v1  ;;  %v21_v3 = vld [vmem:[%s415_s0] sm:$0xff]  ;;  %v22_v4 = vld [vmem:[%s415_s0 + $0x8] sm:$0xff]  ;;  %v97_v8 = vld [vmem:[%s416_s3 + $0x18] sm:$0xff] }
   0x3   :  { %v94_v5 = vld [vmem:[%s416_s3] sm:$0xff]  ;;  %229 = vmatprep.subr.bf16.mxu0 %v310_v0  ;;  %v95_v6 = vld [vmem:[%s416_s3 + $0x8] sm:$0xff]  ;;  %v274_v10 = vpack.c.bf16 %v97_v8, %v96_v7  ;;  %v23_v11 = vpack.c.bf16 %v22_v4, %v21_v3  ;;  %v100_v15 = vld [vmem:[%s416_s3 + $0x30] sm:$0xff] }
   0x4   :  { %v270_v9 = vpack.c.bf16 %v95_v6, %v94_v5  ;;  %v98_v12 = vld [vmem:[%s416_s3 + $0x20] sm:$0xff]  ;;  %v99_v13 = vld [vmem:[%s416_s3 + $0x28] sm:$0xff]  ;;  %v101_v16 = vld [vmem:[%s416_s3 + $0x38] sm:$0xff] }
   0x5   :  { %v278_v14 = vpack.c.bf16 %v99_v13, %v98_v12  ;;  %v282_v17 = vpack.c.bf16 %v101_v16, %v100_v15  ;;  %v102_v18 = vld [vmem:[%s416_s3 + $0x40] sm:$0xff]  ;;  %v103_v19 = vld [vmem:[%s416_s3 + $0x48] sm:$0xff]  ;;  %v104_v21 = vld [vmem:[%s416_s3 + $0x50] sm:$0xff] }
   0x6   :  { %230 = vmatpush3.bf16.msra.mxu0 %v305_v2  ;;  %271 = vmatprep.subr.bf16.mxu1 %v270_v9  ;;  %v286_v20 = vpack.c.bf16 %v103_v19, %v102_v18  ;;  %v105_v22 = vld [vmem:[%s416_s3 + $0x58] sm:$0xff]  ;;  %v106_v24 = vld [vmem:[%s416_s3 + $0x60] sm:$0xff]  ;;  %v107_v25 = vld [vmem:[%s416_s3 + $0x68] sm:$0xff] }
   0x7   :  { %273 = vmatpush3.bf16.msra.mxu1 %v270_v9  ;;  %v290_v23 = vpack.c.bf16 %v105_v22, %v104_v21  ;;  %v294_v26 = vpack.c.bf16 %v107_v25, %v106_v24  ;;  %v108_v27 = vld [vmem:[%s416_s3 + $0x70] sm:$0xff]  ;;  %v109_v28 = vld [vmem:[%s416_s3 + $0x78] sm:$0xff]  ;;  %v201_v30 = vld [vmem:[%s417_s2] ss:$0 sm:$0xff] }
   0x8   :  { %275 = vmatprep.subr.bf16.mxu1 %v274_v10  ;;  %v298_v29 = vpack.c.bf16 %v109_v28, %v108_v27  ;;  %v205_v39 = vld [vmem:[%s418_s4] ss:$0 sm:$0xff] }
   0x9   :  { %232 = vmatmul.mubr.msk.bf16.vlgmr.msra.gmra.mrb[0].mxu0 %vm47_vm1, %v23_v11 }
   0xb   :  { %277 = vmatpush3.bf16.msra.mxu1 %v274_v10 }
   0xc   :  { %279 = vmatprep.subr.bf16.mxu1 %v278_v14 }
   0xf   :  { %281 = vmatpush3.bf16.msra.mxu1 %v278_v14 }
  0x10   :  { %283 = vmatprep.subr.bf16.mxu1 %v282_v17 }
  0x13   :  { %285 = vmatpush3.bf16.msra.mxu1 %v282_v17 }
  0x14   :  { %287 = vmatprep.subr.bf16.mxu1 %v286_v20 }
  0x17   :  { %289 = vmatpush3.bf16.msra.mxu1 %v286_v20 }
  0x18   :  { %291 = vmatprep.subr.bf16.mxu1 %v290_v23 }
  0x1b   :  { %293 = vmatpush3.bf16.msra.mxu1 %v290_v23 }
  0x1c   :  { %295 = vmatprep.subr.bf16.mxu1 %v294_v26 }
  0x1f   :  { %297 = vmatpush3.bf16.msra.mxu1 %v294_v26 }
  0x20   :  { %299 = vmatprep.subr.bf16.mxu1 %v298_v29 }
  0x23   :  { %301 = vmatpush3.bf16.msra.mxu1 %v298_v29 }
  0xdc   :  { %v85_v31 = vpop.f32.mrb[0].mxu0 }
  0xdd   :  { %v233_v32 = vpop.f32.mrb[1].mxu0  ;;  %v86_v33 = vadd.f32 %v201_v30, %v85_v31 }
  0xde   :  { %v88_v34 = vpop.f32.mrb[2].mxu0 }
  0xdf   :  { %v89_v35 = vadd.f32 %v201_v30, %v88_v34  ;;  %v234_v36 = vpop.f32.mrb[3].mxu0  ;;  %v92_v37 = vmax.f32 %v86_v33, 0.0 }
  0xe1   :  { %v93_v38 = vmax.f32 %v89_v35, 0.0  ;;  %267 = vmatprep.mubr.f32.mxu1 %v92_v37 }
  0xe3   :  { %268 = vmatmul.mubr.f32.vlgmr.msra.gmra.mrb[0].mxu1 %v93_v38 }
 0x1b6   :  { %v269_v40 = vpop.f32.mrb[0].mxu1 }
 0x1b7   :  { %v189_v41 = vadd.f32 %v269_v40, %v205_v39  ;;  %v183_v42 = vpop.f32.mrb[1].mxu1 }
 0x1b8   :  { %v184_v43 = vadd.f32 %v205_v39, %v183_v42 }
 0x1b9   :  { %306 = vtanh.f32 %v189_v41 }
 0x1ba   :  { %308 = vtanh.f32 %v184_v43 }
 0x1c3   :  { %v307_v44 = vpop.eup %306 }
 0x1c4   :  { %v309_v45 = vpop.eup %308  ;;  %196 = vst.msk [vmem:[%s419_s5 + $0x8] sm:$0xff] %vm194_vm2, %v307_v44 }
 0x1c5   :  { %195 = vst.msk [vmem:[%s419_s5] sm:$0xff] %vm194_vm2, %v309_v45 }

</bundles_post_ra>
